<compile_context>
chip_gen: v7x
topology: tpu7x:2x2x1
jax: 0.10.0
libtpu: 0.0.40
codegen_flags: <defaults>
</compile_context>

<pallas_src>
import jax
import jax.numpy as jnp
from jax.experimental import pallas as pl
from jax.experimental.pallas import tpu as pltpu

OUT_PAD = 128  # lane-dense padded output width (z_total=6 -> 128)


def mlp_kernel(x_ref, w1_ref, b1_ref, w2_ref, b2_ref, o_ref):
    # x_ref:  (B, 512)  bf16
    # w1_ref: (512, 128) bf16, b1_ref: (1, 128) f32
    # w2_ref: (128, 128) bf16 (zero-padded cols), b2_ref: (1, 128) f32 (zero-padded)
    # o_ref:  (B, 128)  f32
    x = x_ref[...]
    h = jnp.dot(x, w1_ref[...], preferred_element_type=jnp.float32)
    # TODO(synk): nn.Dropout(p=0.5) treated as identity (eval-mode semantics);
    # training-mode dropout would need pltpu.prng_seed/prng_random_bits masking.
    h = jnp.maximum(h + b1_ref[...], 0.0)          # f32 epilogue (bias + ReLU)
    h_bf16 = h.astype(jnp.bfloat16)                # bf16 operand for 2nd MXU dot
    out = jnp.dot(h_bf16, w2_ref[...], preferred_element_type=jnp.float32)
    o_ref[...] = out + b2_ref[...]


def prepare_params(w1, b1, w2, b2):
    """One-time packing: transpose, bf16-cast, bias reshape, lane-pad output dim.

    w1: (128, 512) f32, b1: (128,) f32, w2: (z_total, 128) f32, b2: (z_total,) f32
    """
    z_total = w2.shape[0]
    w1_t = w1.T.astype(jnp.bfloat16)                       # (512, 128) bf16
    b1_2d = b1.reshape(1, -1).astype(jnp.float32)          # (1, 128)   f32
    w2_t = jnp.zeros((128, OUT_PAD), jnp.bfloat16)
    w2_t = w2_t.at[:, :z_total].set(w2.T.astype(jnp.bfloat16))   # (128, 128) bf16
    b2_2d = jnp.zeros((1, OUT_PAD), jnp.float32)
    b2_2d = b2_2d.at[:, :z_total].set(b2.astype(jnp.float32))    # (1, 128)   f32
    return (w1_t, b1_2d, w2_t, b2_2d, z_total)


def simple_mlp_forward(x, packed_params, z_size=6):
    """x: (B, C, H, W) float32. Returns tuple of (B, z_size) chunks."""
    w1_t, b1_2d, w2_t, b2_2d, z_total = packed_params
    B = x.shape[0]
    x_flat = x.reshape(B, -1).astype(jnp.bfloat16)   # nn.Flatten + bf16 operand
    assert x_flat.shape[1] == 512, x_flat.shape

    vmem_spec = pl.BlockSpec(memory_space=pltpu.MemorySpace.VMEM)
    out_pad = pl.pallas_call(
        mlp_kernel,
        out_shape=jax.ShapeDtypeStruct((B, OUT_PAD), jnp.float32),
        in_specs=[vmem_spec] * 5,
        out_specs=vmem_spec,
    )(x_flat, w1_t, b1_2d, w2_t, b2_2d)

    out = out_pad[:, :z_total]
    # torch.split(out, z_size, -1)
    n_chunks = z_total // z_size
    return tuple(out[:, i * z_size:(i + 1) * z_size] for i in range(n_chunks))


def init_params(key, z_dim=6, z_multiplier=1):
    z_total = z_dim * z_multiplier
    k1, k2, k3, k4 = jax.random.split(key, 4)
    # Deterministic synthetic init (matches shapes of nn.Linear weights/biases).
    w1 = jax.random.uniform(k1, (128, 512), jnp.float32, -1.0, 1.0) / jnp.sqrt(512.0)
    b1 = jax.random.uniform(k2, (128,), jnp.float32, -1.0, 1.0) / jnp.sqrt(512.0)
    w2 = jax.random.uniform(k3, (z_total, 128), jnp.float32, -1.0, 1.0) / jnp.sqrt(128.0)
    b2 = jax.random.uniform(k4, (z_total,), jnp.float32, -1.0, 1.0) / jnp.sqrt(128.0)
    return (w1, b1, w2, b2)


if __name__ == "__main__":
    key = jax.random.PRNGKey(0)
    kx, kp = jax.random.split(key)
    # (B, C, H, W) = (2, 4, 16, 8) -> flattens to 512 features per sample.
    x = jax.random.normal(kx, (2, 4, 16, 8), jnp.float32)
    w1, b1, w2, b2 = init_params(kp, z_dim=6, z_multiplier=1)
    packed = prepare_params(w1, b1, w2, b2)   # one-time, out of the hot path

    outs = simple_mlp_forward(x, packed, z_size=6)
    outs = jax.tree_util.tree_map(jax.block_until_ready, outs)
    assert len(outs) == 1 and outs[0].shape == (2, 6)

    # Reference 1: same bf16-operand math in plain JAX (tight tolerance).
    x_flat_bf16 = x.reshape(2, -1).astype(jnp.bfloat16)
    h_ref = jnp.maximum(
        jnp.dot(x_flat_bf16, w1.T.astype(jnp.bfloat16),
                preferred_element_type=jnp.float32) + b1, 0.0)
    ref_bf16 = jnp.dot(h_ref.astype(jnp.bfloat16), w2.T.astype(jnp.bfloat16),
                       preferred_element_type=jnp.float32) + b2
    assert jnp.allclose(outs[0], ref_bf16, atol=1e-2, rtol=1e-2)

    # Reference 2: full-f32 module semantics (loose tolerance for bf16 operands).
    h_f32 = jnp.maximum(x.reshape(2, -1) @ w1.T + b1, 0.0)
    ref_f32 = h_f32 @ w2.T + b2
    assert jnp.allclose(outs[0], ref_f32, atol=5e-2, rtol=5e-2)

    print("KERNEL_OK")
</pallas_src>

<mosaic_0001>
module attributes {stable_mosaic.version = 11 : i64} {
  func.func @mlp_kernel(%arg0: memref<2x512xbf16, #tpu.memory_space<vmem>>, %arg1: memref<512x128xbf16, #tpu.memory_space<vmem>>, %arg2: memref<1x128xf32, #tpu.memory_space<vmem>>, %arg3: memref<128x128xbf16, #tpu.memory_space<vmem>>, %arg4: memref<1x128xf32, #tpu.memory_space<vmem>>, %arg5: memref<2x128xf32, #tpu.memory_space<vmem>>) attributes {dimension_semantics = [], scalar_prefetch = 0 : i64, scratch_operands = 0 : i64, tpu.core_type = #tpu.core_type<tc>} {
    %c0 = arith.constant 0 : index
    %c0_0 = arith.constant 0 : index
    %0 = vector.load %arg0[%c0, %c0_0] : memref<2x512xbf16, #tpu.memory_space<vmem>>, vector<2x512xbf16>
    %c0_1 = arith.constant 0 : index
    %c0_2 = arith.constant 0 : index
    %1 = vector.load %arg1[%c0_1, %c0_2] : memref<512x128xbf16, #tpu.memory_space<vmem>>, vector<512x128xbf16>
    %cst = arith.constant dense<0.000000e+00> : vector<2x128xf32>
    %2 = tpu.matmul %0, %1, %cst {dimension_numbers = #tpu.dot_dimension_numbers<[1], [0], [0], [1], [0, 0, 1, 1], [], []>} : vector<2x512xbf16>, vector<512x128xbf16>, vector<2x128xf32> -> vector<2x128xf32>
    %c0_3 = arith.constant 0 : index
    %c0_4 = arith.constant 0 : index
    %3 = vector.load %arg2[%c0_3, %c0_4] : memref<1x128xf32, #tpu.memory_space<vmem>>, vector<1x128xf32>
    %4 = vector.broadcast %3 : vector<1x128xf32> to vector<2x128xf32>
    %5 = arith.addf %2, %4 : vector<2x128xf32>
    %cst_5 = arith.constant 0.000000e+00 : f32
    %6 = vector.broadcast %cst_5 : f32 to vector<2x128xf32>
    %7 = arith.maximumf %5, %6 : vector<2x128xf32>
    %8 = arith.truncf %7 : vector<2x128xf32> to vector<2x128xbf16>
    %c0_6 = arith.constant 0 : index
    %c0_7 = arith.constant 0 : index
    %9 = vector.load %arg3[%c0_6, %c0_7] : memref<128x128xbf16, #tpu.memory_space<vmem>>, vector<128x128xbf16>
    %cst_8 = arith.constant dense<0.000000e+00> : vector<2x128xf32>
    %10 = tpu.matmul %8, %9, %cst_8 {dimension_numbers = #tpu.dot_dimension_numbers<[1], [0], [0], [1], [0, 0, 1, 1], [], []>} : vector<2x128xbf16>, vector<128x128xbf16>, vector<2x128xf32> -> vector<2x128xf32>
    %c0_9 = arith.constant 0 : index
    %c0_10 = arith.constant 0 : index
    %11 = vector.load %arg4[%c0_9, %c0_10] : memref<1x128xf32, #tpu.memory_space<vmem>>, vector<1x128xf32>
    %12 = vector.broadcast %11 : vector<1x128xf32> to vector<2x128xf32>
    %13 = arith.addf %10, %12 : vector<2x128xf32>
    %c0_11 = arith.constant 0 : index
    %c0_12 = arith.constant 0 : index
    %14 = vector.load %arg5[%c0_11, %c0_12] : memref<2x128xf32, #tpu.memory_space<vmem>>, vector<2x128xf32>
    tpu.vector_store %arg5[%c0_11, %c0_12], %13 {strides = array<i32>} : memref<2x128xf32, #tpu.memory_space<vmem>>, vector<2x128xf32>,
    return
  }
}

</mosaic_0001>

<bundles_post_ra>
// kernel: tpu_custom_call.1
= control target key start
LH: loop header
LB: loop body
LE: loop exit
PB: predicated region body
PF: predicated region fallthrough
CT: control target
= control target key end

     0   :  { %10 = vsyncpa [#allocation3], 0  ;;  %s922_s0 = inlined_call_operand.hbm [shape: bf16[2,512], index: 0, kind: input, shape index: {}]   ;;  %s923_s1 = inlined_call_operand.hbm [shape: bf16[512,128], index: 1, kind: input, shape index: {}]   ;;  %s924_s2 = inlined_call_operand.vmem [shape: f32[1,128], index: 2, kind: input, shape index: {}]   ;;  %s925_s3 = inlined_call_operand.hbm [shape: bf16[128,128], index: 3, kind: input, shape index: {}]   ;;  %s926_s4 = inlined_call_operand.vmem [shape: f32[1,128], index: 4, kind: input, shape index: {}]   ;;  %s927_s5 = inlined_call_operand.hbm [shape: f32[2,128], index: 5, kind: output, shape index: {}]  }
   0x1   :  { %11 = vsyncpa [#allocation6], 0 }
   0x2   :  { %12 = vsyncpa [#allocation4], 0  ;;  %s823_s18 = smov [#allocation5]   ;;  %s729_s22 = scalar_lea.hbm %s923_s1, 4096 }
   0x3   :  { %s28_s19 = sshll.u32 %s823_s18, 4  ;;  %p730_p0 = scmp.ne.s32.totalorder %s923_s1, %s729_s22  ;;  %s29_s19 = int_to_ptr.vmem [resolvable:$true] %s28_s19 }
   0x4   :  { %p733_p1 = scmp.lt.u32.totalorder %s729_s22, %s923_s1 }
   0x6   :  { %p735_p2 = pnand %p733_p1, %p730_p0 }
   0x8   :  { %738 = shalt.err (!%p735_p2)
}
   0x9   :  { %s739_s27 = scalar_lea.vmem %s29_s19, 4096  ;;  %p744_p4 = scmp.lt.s32.totalorder %s29_s19, %s29_s19 }
   0xa   :  { %p740_p3 = scmp.ne.s32.totalorder %s29_s19, %s739_s27  ;;  %p745_p5 = scmp.lt.s32.totalorder %s739_s27, %s739_s27 }
   0xc   :  { %p746_p6 = por %p745_p5, %p744_p4 }
   0xe   :  { %p747_p7 = pnand %p746_p6, %p740_p3 }
  0x10   :  { %750 = shalt.err (!%p747_p7)
}
  0x11   :  { %s824_s28 = smov 64   ;;  %s825_s29 = smov 4  }
  0x12   :  { %34 = dma.hbm_to_vmem [thread:$0]  %s923_s1, 4096, %s29_s19, [#allocation6], %s824_s28, %s824_s28, %s825_s29  }
  0x13   :  { %s826_s7 = smov [#allocation2]   ;;  %s827_s9 = smov [#allocation7]  }
  0x14   :  { %s19_s8 = sshll.u32 %s826_s7, 4  ;;  %s42_s10 = sshll.u32 %s827_s9, 4  ;;  %s20_s8 = int_to_ptr.vmem [resolvable:$true] %s19_s8  ;;  %s43_s10 = int_to_ptr.vmem [resolvable:$true] %s42_s10 }
  0x15   :  { %s751_s13 = scalar_lea.hbm %s922_s0, 64 }
  0x16   :  { %p752_p8 = scmp.ne.s32.totalorder %s922_s0, %s751_s13  ;;  %p755_p9 = scmp.lt.u32.totalorder %s751_s13, %s922_s0 }
  0x18   :  { %p757_p10 = pnand %p755_p9, %p752_p8 }
  0x1a   :  { %760 = shalt.err (!%p757_p10)
}
  0x1b   :  { %s761_s1 = scalar_lea.vmem %s20_s8, 64  ;;  %p766_p12 = scmp.lt.s32.totalorder %s20_s8, %s20_s8 }
  0x1c   :  { %p762_p11 = scmp.ne.s32.totalorder %s20_s8, %s761_s1  ;;  %p767_p13 = scmp.lt.s32.totalorder %s761_s1, %s761_s1 }
  0x1e   :  { %p768_p0 = por %p767_p13, %p766_p12 }
  0x20   :  { %p769_p1 = pnand %p768_p0, %p762_p11 }
  0x22   :  { %772 = shalt.err (!%p769_p1)
}
  0x23   :  { %22 = dma.hbm_to_vmem [thread:$0]  %s922_s0, 64, %s20_s8, [#allocation3]  }
  0x24   :  { %s773_s22 = scalar_lea.hbm %s925_s3, 1024 }
  0x25   :  { %p774_p2 = scmp.ne.s32.totalorder %s925_s3, %s773_s22  ;;  %p777_p3 = scmp.lt.u32.totalorder %s773_s22, %s925_s3 }
  0x27   :  { %p779_p4 = pnand %p777_p3, %p774_p2 }
  0x29   :  { %782 = shalt.err (!%p779_p4)
}
  0x2a   :  { %s783_s27 = scalar_lea.vmem %s43_s10, 1024  ;;  %p788_p6 = scmp.lt.s32.totalorder %s43_s10, %s43_s10 }
  0x2b   :  { %p784_p5 = scmp.ne.s32.totalorder %s43_s10, %s783_s27  ;;  %p789_p7 = scmp.lt.s32.totalorder %s783_s27, %s783_s27 }
  0x2d   :  { %p790_p8 = por %p789_p7, %p788_p6 }
  0x2f   :  { %p791_p9 = pnand %p790_p8, %p784_p5 }
  0x31   :  { %794 = shalt.err (!%p791_p9)
}
  0x32   :  { %48 = dma.hbm_to_vmem [thread:$0]  %s925_s3, 1024, %s43_s10, [#allocation6], %s824_s28, %s824_s28, %s825_s29  }
  0x33   :  { %817 = dma.done.wait [#allocation3], 64  }
  0x34   :  { %818 = vsyncadd [#allocation3], 4294967232 }
  0x35   :  { %819 = dma.done.wait [#allocation6], 5120  }
  0x36   :  { %820 = vsyncadd [#allocation6], 4294962176  ;;  %v689_v0 = vld [vmem:[#allocation5 + $0x40] sm:$0xff]   ;;  %v693_v4 = vld [vmem:[#allocation5 + $0x48] sm:$0xff]   ;;  %v828_v22 = vmov 1966171168   ;;  %v145_v24 = vlaneseq }
  0x37   :  { %v690_v1 = vld [vmem:[#allocation5 + $0xc0] sm:$0xff]   ;;  %607 = vmatprep.subr.bf16.mxu0 %v689_v0  ;;  %v694_v5 = vld [vmem:[#allocation5 + $0xc8] sm:$0xff]   ;;  %v697_v8 = vld [vmem:[#allocation5 + $0x50] sm:$0xff]   ;;  %v143_v23 = vunpack.c.l.s4 %v828_v22  ;;  %v829_v41 = vmov 0.0   ;;  %vm830_vm0 = vmmov 0   ;;  %s831_s7 = smov [#allocation8]  }
  0x38   :  { %v691_v2 = vld [vmem:[#allocation5] sm:$0xff]   ;;  %629 = vmatprep.subr.bf16.mxu1 %v690_v1  ;;  %v695_v6 = vld [vmem:[#allocation5 + $0x8] sm:$0xff]   ;;  %v698_v9 = vld [vmem:[#allocation5 + $0xd0] sm:$0xff]   ;;  %v146_v30 = vshrl.u32 %v145_v24, 7 }
  0x39   :  { %v692_v3 = vld [vmem:[#allocation5 + $0x80] sm:$0xff]   ;;  %608 = vmatpush3.bf16.msra.mxu0 %v691_v2  ;;  %v696_v7 = vld [vmem:[#allocation5 + $0x88] sm:$0xff]   ;;  %v699_v10 = vld [vmem:[#allocation5 + $0x10] sm:$0xff]   ;;  %v144_v29 = vunpack.c.0.s8 %v143_v23 }
  0x3a   :  { %630 = vmatpush3.bf16.msra.mxu1 %v692_v3  ;;  %609 = vmatprep.subr.bf16.mxu0 %v693_v4  ;;  %v700_v11 = vld [vmem:[#allocation5 + $0x90] sm:$0xff]   ;;  %v701_v12 = vld [vmem:[#allocation5 + $0x58] sm:$0xff]   ;;  %v705_v16 = vld [vmem:[#allocation5 + $0x60] sm:$0xff]  }
  0x3b   :  { %631 = vmatprep.subr.bf16.mxu1 %v694_v5  ;;  %v702_v13 = vld [vmem:[#allocation5 + $0xd8] sm:$0xff]   ;;  %v706_v17 = vld [vmem:[#allocation5 + $0xe0] sm:$0xff]   ;;  %v709_v20 = vld [vmem:[#allocation5 + $0x68] sm:$0xff]   ;;  %v147_v35 = vsub.s32 %v144_v29, %v146_v30 }
  0x3c   :  { %v703_v14 = vld [vmem:[#allocation5 + $0x18] sm:$0xff]   ;;  %v707_v18 = vld [vmem:[#allocation5 + $0x20] sm:$0xff]   ;;  %v710_v21 = vld [vmem:[#allocation5 + $0xe8] sm:$0xff]  }
  0x3d   :  { %610 = vmatpush3.bf16.msra.mxu0 %v695_v6  ;;  %v704_v15 = vld [vmem:[#allocation5 + $0x98] sm:$0xff]   ;;  %v708_v19 = vld [vmem:[#allocation5 + $0xa0] sm:$0xff]   ;;  %v711_v25 = vld [vmem:[#allocation5 + $0x28] sm:$0xff]  }
  0x3e   :  { %632 = vmatpush3.bf16.msra.mxu1 %v696_v7  ;;  %611 = vmatprep.subr.bf16.mxu0 %v697_v8  ;;  %v712_v26 = vld [vmem:[#allocation5 + $0xa8] sm:$0xff]   ;;  %v713_v27 = vld [vmem:[#allocation5 + $0x70] sm:$0xff]   ;;  %v717_v33 = vld [vmem:[#allocation5 + $0x78] sm:$0xff]  }
  0x3f   :  { %633 = vmatprep.subr.bf16.mxu1 %v698_v9  ;;  %v714_v28 = vld [vmem:[#allocation5 + $0xf0] sm:$0xff]   ;;  %v718_v34 = vld [vmem:[#allocation5 + $0xf8] sm:$0xff]   ;;  %v721_v43 = vld [vmem:[#allocation7] sm:$0xff]  }
  0x40   :  { %v715_v31 = vld [vmem:[#allocation5 + $0x30] sm:$0xff]   ;;  %v719_v36 = vld [vmem:[#allocation5 + $0x38] sm:$0xff]   ;;  %v722_v46 = vld [vmem:[#allocation7 + $0x8] sm:$0xff]  }
  0x41   :  { %612 = vmatpush3.bf16.msra.mxu0 %v699_v10  ;;  %v716_v32 = vld [vmem:[#allocation5 + $0xb0] sm:$0xff]   ;;  %v720_v37 = vld [vmem:[#allocation5 + $0xb8] sm:$0xff]   ;;  %v725_v49 = vld [vmem:[#allocation7 + $0x20] sm:$0xff]  }
  0x42   :  { %634 = vmatpush3.bf16.msra.mxu1 %v700_v11  ;;  %613 = vmatprep.subr.bf16.mxu0 %v701_v12  ;;  %v565_v38 = vld.sshfl [vmem:[#allocation2] sm:$0x33 pattern:$0x75316420]  ;;  %v723_v47 = vld [vmem:[#allocation7 + $0x10] sm:$0xff]   ;;  %v726_v50 = vld [vmem:[#allocation7 + $0x28] sm:$0xff]  }
  0x43   :  { %635 = vmatprep.subr.bf16.mxu1 %v702_v13  ;;  %v141_v39 = vcombine.high %v565_v38, %v565_v38  ;;  %v148_v40 = vrot.slane %v565_v38, %v147_v35  ;;  %v724_v48 = vld [vmem:[#allocation7 + $0x18] sm:$0xff]   ;;  %v727_v51 = vld [vmem:[#allocation7 + $0x30] sm:$0xff]  }
  0x44   :  { %v728_v52 = vld [vmem:[#allocation7 + $0x38] sm:$0xff]  }
  0x45   :  { %614 = vmatpush3.bf16.msra.mxu0 %v703_v14  ;;  %v155_v42 = vrot.slane %v141_v39, %v147_v35  ;;  %v156_v44 = vcombine.high %v148_v40, %v148_v40  ;;  %v564_v54 = vld [vmem:[%s924_s2] ss:$0 sm:$0xff]  ;;  %s554_s2 = sshll.u32 %s831_s7, 4  ;;  %s555_s2 = int_to_ptr.vmem [resolvable:$true] %s554_s2 }
  0x46   :  { %636 = vmatpush3.bf16.msra.mxu1 %v704_v15  ;;  %615 = vmatprep.subr.bf16.mxu0 %v705_v16  ;;  %v598_v4 = vld [vmem:[%s926_s4] ss:$0 sm:$0xff]  ;;  %s795_s8 = scalar_lea.vmem %s555_s2, 32  ;;  %p800_p11 = scmp.lt.s32.totalorder %s555_s2, %s555_s2 }
  0x47   :  { %637 = vmatprep.subr.bf16.mxu1 %v706_v17  ;;  %386 = vmatprep.mubr.bf16.mxu0 %v155_v42  ;;  %v157_v45 = vcombine.high %v155_v42, %v155_v42  ;;  %p796_p10 = scmp.ne.s32.totalorder %s555_s2, %s795_s8  ;;  %p801_p12 = scmp.lt.s32.totalorder %s795_s8, %s795_s8 }
  0x49   :  { %616 = vmatpush3.bf16.msra.mxu0 %v707_v18  ;;  %426 = vmatprep.mubr.bf16.mxu1 %v157_v45  ;;  %p802_p13 = por %p801_p12, %p800_p11 }
  0x4a   :  { %638 = vmatpush3.bf16.msra.mxu1 %v708_v19  ;;  %617 = vmatprep.subr.bf16.mxu0 %v709_v20 }
  0x4b   :  { %639 = vmatprep.subr.bf16.mxu1 %v710_v21  ;;  %p803_p0 = pnand %p802_p13, %p796_p10 }
  0x4d   :  { %618 = vmatpush3.bf16.msra.mxu0 %v711_v25 }
  0x4e   :  { %640 = vmatpush3.bf16.msra.mxu1 %v712_v26  ;;  %619 = vmatprep.subr.bf16.mxu0 %v713_v27 }
  0x4f   :  { %641 = vmatprep.subr.bf16.mxu1 %v714_v28 }
  0x51   :  { %620 = vmatpush3.bf16.msra.mxu0 %v715_v31 }
  0x52   :  { %642 = vmatpush3.bf16.msra.mxu1 %v716_v32  ;;  %621 = vmatprep.subr.bf16.mxu0 %v717_v33 }
  0x53   :  { %643 = vmatprep.subr.bf16.mxu1 %v718_v34 }
  0x55   :  { %622 = vmatpush3.bf16.msra.mxu0 %v719_v36 }
  0x56   :  { %644 = vmatpush3.bf16.msra.mxu1 %v720_v37  ;;  %660 = vmatprep.subr.bf16.mxu0 %v829_v41 }
  0x58   :  { %387 = vmatmul.mubr.bf16.vlgmr.msra.gmra.mrb[0].mxu0 %v148_v40 }
  0x59   :  { %661 = vmatpush3.bf16.msra.mxu0 %v721_v43  ;;  %427 = vmatmul.mubr.bf16.vlgmr.msra.gmra.mrb[0].mxu1 %v156_v44 }
  0x5a   :  { %662 = vmatprep.subr.bf16.mxu0 %v829_v41  ;;  %676 = vmatprep.mubr.msk.bf16.mxu0 %vm830_vm0, %v829_v41 }
  0x5d   :  { %663 = vmatpush3.bf16.msra.mxu0 %v722_v46 }
  0x5e   :  { %664 = vmatprep.subr.bf16.mxu0 %v829_v41 }
  0x61   :  { %665 = vmatpush3.bf16.msra.mxu0 %v723_v47 }
  0x62   :  { %666 = vmatprep.subr.bf16.mxu0 %v829_v41 }
  0x65   :  { %667 = vmatpush3.bf16.msra.mxu0 %v724_v48 }
  0x66   :  { %668 = vmatprep.subr.bf16.mxu0 %v829_v41 }
  0x69   :  { %669 = vmatpush3.bf16.msra.mxu0 %v725_v49 }
  0x6a   :  { %670 = vmatprep.subr.bf16.mxu0 %v829_v41 }
  0x6d   :  { %671 = vmatpush3.bf16.msra.mxu0 %v726_v50 }
  0x6e   :  { %672 = vmatprep.subr.bf16.mxu0 %v829_v41 }
  0x71   :  { %673 = vmatpush3.bf16.msra.mxu0 %v727_v51 }
  0x72   :  { %674 = vmatprep.subr.bf16.mxu0 %v829_v41 }
  0x75   :  { %675 = vmatpush3.bf16.msra.mxu0 %v728_v52 }
 0x12b   :  { %v623_v53 = vpop.f32.mrb[0].mxu0 }
 0x12c   :  { %v624_v55 = vpop.f32.mrb[1].mxu0  ;;  %v645_v56 = vpop.f32.mrb[0].mxu1 }
 0x12d   :  { %v625_v57 = vadd.f32 %v624_v55, %v623_v53  ;;  %v626_v58 = vpop.f32.mrb[2].mxu0  ;;  %v646_v59 = vpop.f32.mrb[1].mxu1 }
 0x12e   :  { %v627_v60 = vpop.f32.mrb[3].mxu0  ;;  %v647_v62 = vadd.f32 %v646_v59, %v645_v56  ;;  %v648_v63 = vpop.f32.mrb[2].mxu1 }
 0x12f   :  { %v389_v61 = vadd.f32 %v625_v57, %v564_v54  ;;  %v649_v0 = vpop.f32.mrb[3].mxu1 }
 0x131   :  { %v429_v1 = vadd.f32 %v647_v62, %v389_v61 }
 0x133   :  { %v434_v2 = vmax.f32 %v429_v1, 0.0 }
 0x135   :  { %v435_v3 = vpack.c.bf16 %v434_v2, %v434_v2 }
 0x137   :  { %677 = vmatmul.mubr.bf16.vlgmr.msra.gmra.mrb[4].mxu0 %v435_v3 }
 0x20a   :  { %v541_v5 = vpop.f32.mrb[4].mxu0 }
 0x20b   :  { %v542_v6 = vadd.f32 %v598_v4, %v541_v5  ;;  %v678_v7 = vpop.f32.mrb[5].mxu0 }
 0x20c   :  { %v544_v8 = vpop.f32.mrb[6].mxu0 }
 0x20d   :  { %547 = vst [vmem:[#allocation8] sm:$0x3] %v542_v6  ;;  %v679_v9 = vpop.f32.mrb[7].mxu0 }
 0x20e   :  { %806 = shalt.err (!%p803_p0)
}
 0x20f   :  { %s807_s4 = scalar_lea.hbm %s927_s5, 32 }
 0x210   :  { %p808_p1 = scmp.ne.s32.totalorder %s927_s5, %s807_s4  ;;  %p811_p2 = scmp.lt.u32.totalorder %s807_s4, %s927_s5 }
 0x212   :  { %p813_p3 = pnand %p811_p2, %p808_p1 }
 0x214   :  { %816 = shalt.err (!%p813_p3)
}
 0x215   :  { %557 = dma.vmem_to_hbm [thread:$0]  %s555_s2, 32, %s927_s5, [#allocation4]  }
 0x216   :  { %821 = dma.done.wait [#allocation4], 32  }
 0x217   :  { %822 = vsyncadd [#allocation4], 4294967264 }
 0x218   :  { %561 = vsyncpa [#allocation3], 1 }
 0x219   :  { %562 = vsyncpa [#allocation6], 1 }
 0x21a   :  { %563 = vsyncpa [#allocation4], 1 }

</bundles_post_ra>
